<compile_context>
chip_gen: v7x
topology: tpu7x:2x2x1
jax: 0.10.0
libtpu: 0.0.40
codegen_flags: <defaults>
</compile_context>

<pallas_src>
import functools

import jax
import jax.numpy as jnp
from jax.experimental import pallas as pl
from jax.experimental.pallas import tpu as pltpu


def _round_up(x, m):
    return ((x + m - 1) // m) * m


def _round_down(x, m):
    return (x // m) * m


def _ws_linear_kernel(x_ref, w_ref, b_ref, o_ref, *scratch, scale):
    """Computes one (tm, tn) output tile; K is the innermost ('arbitrary') axis."""
    acc_ref = scratch[0] if scratch else o_ref  # f32 output: accumulate in place
    k = pl.program_id(2)

    @pl.when(k == 0)
    def _():
        acc_ref[...] = jnp.zeros_like(acc_ref)

    # Canonical (tm, tk) x (tk, tn) MXU contraction with an f32 accumulator.
    acc_ref[...] += jnp.dot(
        x_ref[...], w_ref[...], preferred_element_type=jnp.float32
    )

    @pl.when(k == pl.num_programs(2) - 1)
    def _():
        # Epilogue: scale*(x @ W^T) == (scale*x) @ W^T, so scale + bias are
        # applied exactly once, in f32, before the final cast/store.
        o_ref[...] = (acc_ref[...] * scale + b_ref[...]).astype(o_ref.dtype)


@functools.partial(jax.jit, static_argnames=("compute_dtype", "tm", "tn", "tk"))
def ws_linear(x, weight, bias, *, compute_dtype=jnp.bfloat16,
              tm=512, tn=512, tk=1024):
    """x: (B, in_f), weight: (out_f, in_f), bias: (out_f,).

    Returns y = (x * sqrt(2/in_f)) @ weight.T + bias with dtype == x.dtype.
    """
    B, in_f = x.shape
    out_f = weight.shape[0]
    scale = float((2.0 / in_f) ** 0.5)
    out_dtype = x.dtype

    cdt = jnp.dtype(compute_dtype)
    sub = 16 if cdt.itemsize == 2 else 8  # sublane packing multiple

    # ---- tile selection (full-dim blocks are always legal) ----
    tm = B if B <= tm else _round_down(tm, sub)
    tn = out_f if out_f <= tn else _round_down(tn, 128)
    if B <= tm and out_f >= 256:
        # M grid collapsed to 1: split N so a parallel axis is >= 2-wide
        # (keeps both TensorCores busy on v7x; harmless on v5e/v6e).
        tn = min(tn, _round_up(pl.cdiv(out_f, 2), 128))
    if B <= 128:
        # Small-batch regime: spend VMEM on K depth instead of M.
        tk = max(tk, 2048)
    if in_f <= tk:
        tk = in_f
    else:
        tk = _round_down(tk, 128)
        # Prefer a K tile that divides in_f exactly -> no padding pass at all.
        for cand in range(tk, max(tk // 2, 128) - 1, -128):
            if in_f % cand == 0:
                tk = cand
                break
    Kp = _round_up(in_f, tk)

    # ---- operand prep (fuses with the dtype cast under jit) ----
    # TODO(synk): for real module use, hoist the weight transpose/cast/pad to
    # parameter-init time instead of the per-call path (weights are static).
    xk = x.astype(compute_dtype)
    wt = weight.T.astype(compute_dtype)  # (in_f, out_f): canonical K-major layout
    if Kp != in_f:                       # zero K-padding is exact for the dot
        xk = jnp.pad(xk, ((0, 0), (0, Kp - in_f)))
        wt = jnp.pad(wt, ((0, Kp - in_f), (0, 0)))
    b2 = bias.astype(jnp.float32).reshape(1, out_f)

    grid = (pl.cdiv(B, tm), pl.cdiv(out_f, tn), Kp // tk)

    use_acc = out_dtype != jnp.float32
    scratch_shapes = [pltpu.VMEM((tm, tn), jnp.float32)] if use_acc else []

    # VMEM budget from the actual footprint (double-buffered inputs + output)
    # plus headroom, capped at 48 MiB (<= ~75% of v7x's 64 MiB physical VMEM).
    in_b, out_b = cdt.itemsize, jnp.dtype(out_dtype).itemsize
    tile_bytes = 2 * (tm * tk * in_b + tk * tn * in_b + tn * 4 + tm * tn * out_b)
    if use_acc:
        tile_bytes += tm * tn * 4
    vmem_limit = min(max(tile_bytes + tile_bytes // 2 + (2 << 20), 16 << 20),
                     48 << 20)

    out = pl.pallas_call(
        functools.partial(_ws_linear_kernel, scale=scale),
        out_shape=jax.ShapeDtypeStruct((B, out_f), out_dtype),
        grid_spec=pltpu.PrefetchScalarGridSpec(
            num_scalar_prefetch=0,
            grid=grid,
            in_specs=[
                pl.BlockSpec((tm, tk), lambda i, j, k: (i, k)),  # x
                pl.BlockSpec((tk, tn), lambda i, j, k: (k, j)),  # W^T (K-major)
                pl.BlockSpec((1, tn), lambda i, j, k: (0, j)),   # bias row
            ],
            out_specs=pl.BlockSpec((tm, tn), lambda i, j, k: (i, j)),
            scratch_shapes=scratch_shapes,
        ),
        compiler_params=pltpu.CompilerParams(
            dimension_semantics=("parallel", "parallel", "arbitrary"),
            vmem_limit_bytes=int(vmem_limit),
        ),
    )(xk, wt, b2)

    return out


if __name__ == "__main__":
    key = jax.random.PRNGKey(0)
    k_x, k_w = jax.random.split(key)

    batch, in_features, out_features = 8, 32, 64
    scale = (2.0 / in_features) ** 0.5

    # Deterministic parameter init mirroring the module's __init__:
    #   nn.init.normal_(weight), nn.init.zeros_(bias)
    weight = jax.random.normal(k_w, (out_features, in_features), dtype=jnp.float32)
    bias = jnp.zeros((out_features,), dtype=jnp.float32)
    x = jax.random.normal(k_x, (batch, in_features), dtype=jnp.float32)

    # Pure-JAX reference (same math as the PyTorch forward).
    y_ref = (x * scale) @ weight.T + bias[None, :]

    # 1) Exact-semantics path (f32 operands, f32 accumulate): tight tolerance.
    y32 = ws_linear(x, weight, bias, compute_dtype=jnp.float32)
    jax.block_until_ready(y32)
    assert y32.shape == (batch, out_features) and y32.dtype == jnp.float32
    assert jnp.allclose(y32, y_ref, atol=1e-4, rtol=1e-4)

    # 2) Fast default path (bf16 operands, f32 accumulate): relaxed tolerance.
    y16 = ws_linear(x, weight, bias)
    jax.block_until_ready(y16)
    assert y16.shape == (batch, out_features) and y16.dtype == jnp.float32
    assert jnp.allclose(y16, y_ref, atol=5e-2, rtol=5e-2)

    # 3) bf16 input/output exercises the separate f32-accumulator branch.
    ybf = ws_linear(x.astype(jnp.bfloat16), weight, bias)
    jax.block_until_ready(ybf)
    assert ybf.shape == (batch, out_features) and ybf.dtype == jnp.bfloat16
    assert jnp.allclose(ybf.astype(jnp.float32), y_ref, atol=1e-1, rtol=1e-1)

    print("KERNEL_OK")
</pallas_src>

<mosaic_0001>
module attributes {stable_mosaic.version = 11 : i64} {
  func.func @_ws_linear_kernel(%arg0: i32, %arg1: i32, %arg2: i32, %arg3: memref<8x32xf32, #tpu.memory_space<vmem>>, %arg4: memref<32x64xf32, #tpu.memory_space<vmem>>, %arg5: memref<1x64xf32, #tpu.memory_space<vmem>>, %arg6: memref<8x64xf32, #tpu.memory_space<vmem>>) attributes {dimension_semantics = [#tpu.dimension_semantics<parallel>, #tpu.dimension_semantics<parallel>, #tpu.dimension_semantics<arbitrary>], iteration_bounds = array<i64: 1, 1, 1>, scalar_prefetch = 0 : i64, scratch_operands = 0 : i64, tpu.core_type = #tpu.core_type<tc>, window_params = [{transform_indices = @transform_0, window_bounds = array<i64: 8, 32>}, {transform_indices = @transform_1, window_bounds = array<i64: 32, 64>}, {transform_indices = @transform_2, window_bounds = array<i64: 1, 64>}, {transform_indices = @transform_3, window_bounds = array<i64: 8, 64>}]} {
    %c0_i32 = arith.constant 0 : i32
    %0 = arith.cmpi eq, %arg2, %c0_i32 : i32
    %1 = arith.extui %0 : i1 to i32
    %c0_i32_0 = arith.constant 0 : i32
    %2 = arith.cmpi ne, %1, %c0_i32_0 : i32
    scf.if %2 {
      %cst_10 = arith.constant 0.000000e+00 : f32
      %12 = vector.broadcast %cst_10 : f32 to vector<8x64xf32>
      %c0_11 = arith.constant 0 : index
      %c0_12 = arith.constant 0 : index
      %13 = vector.load %arg6[%c0_11, %c0_12] : memref<8x64xf32, #tpu.memory_space<vmem>>, vector<8x64xf32>
      tpu.vector_store %arg6[%c0_11, %c0_12], %12 {strides = array<i32>} : memref<8x64xf32, #tpu.memory_space<vmem>>, vector<8x64xf32>,
    } else {
    }
    %c0 = arith.constant 0 : index
    %c0_1 = arith.constant 0 : index
    %3 = vector.load %arg6[%c0, %c0_1] : memref<8x64xf32, #tpu.memory_space<vmem>>, vector<8x64xf32>
    %c0_2 = arith.constant 0 : index
    %c0_3 = arith.constant 0 : index
    %4 = vector.load %arg3[%c0_2, %c0_3] : memref<8x32xf32, #tpu.memory_space<vmem>>, vector<8x32xf32>
    %c0_4 = arith.constant 0 : index
    %c0_5 = arith.constant 0 : index
    %5 = vector.load %arg4[%c0_4, %c0_5] : memref<32x64xf32, #tpu.memory_space<vmem>>, vector<32x64xf32>
    %cst = arith.constant dense<0.000000e+00> : vector<8x64xf32>
    %6 = tpu.matmul %4, %5, %cst {dimension_numbers = #tpu.dot_dimension_numbers<[1], [0], [0], [1], [0, 0, 1, 1], [], []>} : vector<8x32xf32>, vector<32x64xf32>, vector<8x64xf32> -> vector<8x64xf32>
    %7 = arith.addf %3, %6 : vector<8x64xf32>
    %c0_6 = arith.constant 0 : index
    %c0_7 = arith.constant 0 : index
    %8 = vector.load %arg6[%c0_6, %c0_7] : memref<8x64xf32, #tpu.memory_space<vmem>>, vector<8x64xf32>
    tpu.vector_store %arg6[%c0_6, %c0_7], %7 {strides = array<i32>} : memref<8x64xf32, #tpu.memory_space<vmem>>, vector<8x64xf32>,
    %c0_i32_8 = arith.constant 0 : i32
    %9 = arith.cmpi eq, %arg2, %c0_i32_8 : i32
    %10 = arith.extui %9 : i1 to i32
    %c0_i32_9 = arith.constant 0 : i32
    %11 = arith.cmpi ne, %10, %c0_i32_9 : i32
    scf.if %11 {
      %c0_10 = arith.constant 0 : index
      %c0_11 = arith.constant 0 : index
      %12 = vector.load %arg6[%c0_10, %c0_11] : memref<8x64xf32, #tpu.memory_space<vmem>>, vector<8x64xf32>
      %cst_12 = arith.constant 2.500000e-01 : f32
      %13 = vector.broadcast %cst_12 : f32 to vector<8x64xf32>
      %14 = arith.mulf %12, %13 : vector<8x64xf32>
      %c0_13 = arith.constant 0 : index
      %c0_14 = arith.constant 0 : index
      %15 = vector.load %arg5[%c0_13, %c0_14] : memref<1x64xf32, #tpu.memory_space<vmem>>, vector<1x64xf32>
      %16 = vector.broadcast %15 : vector<1x64xf32> to vector<8x64xf32>
      %17 = arith.addf %14, %16 : vector<8x64xf32>
      %c0_15 = arith.constant 0 : index
      %c0_16 = arith.constant 0 : index
      %18 = vector.load %arg6[%c0_15, %c0_16] : memref<8x64xf32, #tpu.memory_space<vmem>>, vector<8x64xf32>
      tpu.vector_store %arg6[%c0_15, %c0_16], %17 {strides = array<i32>} : memref<8x64xf32, #tpu.memory_space<vmem>>, vector<8x64xf32>,
    } else {
    }
    return
  }
  func.func @transform_0(%arg0: i32, %arg1: i32, %arg2: i32) -> (i32, i32) {
    %c0_i32 = arith.constant 0 : i32
    return %arg0, %arg2 : i32, i32
  }
  func.func @transform_1(%arg0: i32, %arg1: i32, %arg2: i32) -> (i32, i32) {
    %c0_i32 = arith.constant 0 : i32
    return %arg2, %arg1 : i32, i32
  }
  func.func @transform_2(%arg0: i32, %arg1: i32, %arg2: i32) -> (i32, i32) {
    %c0_i32 = arith.constant 0 : i32
    %c0_i32_0 = arith.constant 0 : i32
    return %c0_i32, %arg1 : i32, i32
  }
  func.func @transform_3(%arg0: i32, %arg1: i32, %arg2: i32) -> (i32, i32) {
    %c0_i32 = arith.constant 0 : i32
    return %arg0, %arg1 : i32, i32
  }
}

</mosaic_0001>

<bundles_post_ra>
// kernel: ws_linear.1
= control target key start
LH: loop header
LB: loop body
LE: loop exit
PB: predicated region body
PF: predicated region fallthrough
CT: control target
= control target key end

     0   :  { %8 = vsyncpa [#allocation3], 0  ;;  %s341_s0 = inlined_call_operand.hbm [shape: f32[8,32], index: 0, kind: input, shape index: {}]   ;;  %s342_s1 = inlined_call_operand.hbm [shape: f32[32,64], index: 1, kind: input, shape index: {}]   ;;  %s343_s2 = inlined_call_operand.vmem [shape: f32[1,64], index: 2, kind: input, shape index: {}]   ;;  %s344_s3 = inlined_call_operand.hbm [shape: f32[8,64], index: 3, kind: output, shape index: {}]  }
   0x1   :  { %9 = vsyncpa [#allocation6], 0 }
   0x2   :  { %10 = vsyncpa [#allocation4], 0  ;;  %s264_s12 = smov [#allocation2]   ;;  %s265_s14 = smov [#allocation5]  }
   0x3   :  { %s17_s13 = sshll.u32 %s264_s12, 4  ;;  %s26_s15 = sshll.u32 %s265_s14, 4  ;;  %s18_s13 = int_to_ptr.vmem [resolvable:$true] %s17_s13  ;;  %s292_s15 = int_to_ptr.vmem [resolvable:$true] %s26_s15 }
   0x4   :  { %s192_s18 = scalar_lea.hbm %s341_s0, 128 }
   0x5   :  { %p193_p0 = scmp.ne.s32.totalorder %s341_s0, %s192_s18  ;;  %p196_p1 = scmp.lt.u32.totalorder %s192_s18, %s341_s0 }
   0x7   :  { %p198_p2 = pnand %p196_p1, %p193_p0 }
   0x9   :  { %201 = shalt.err (!%p198_p2)
}
   0xa   :  { %s202_s23 = scalar_lea.vmem %s18_s13, 128  ;;  %p207_p4 = scmp.lt.s32.totalorder %s18_s13, %s18_s13 }
   0xb   :  { %p203_p3 = scmp.ne.s32.totalorder %s18_s13, %s202_s23  ;;  %p208_p5 = scmp.lt.s32.totalorder %s202_s23, %s202_s23 }
   0xd   :  { %p209_p6 = por %p208_p5, %p207_p4 }
   0xf   :  { %p210_p7 = pnand %p209_p6, %p203_p3 }
  0x11   :  { %213 = shalt.err (!%p210_p7)
}
  0x12   :  { %20 = dma.hbm_to_vmem [thread:$0]  %s341_s0, 128, %s18_s13, [#allocation3]  }
  0x13   :  { %s214_s28 = scalar_lea.hbm %s342_s1, 512 }
  0x14   :  { %p215_p8 = scmp.ne.s32.totalorder %s342_s1, %s214_s28  ;;  %p218_p9 = scmp.lt.u32.totalorder %s214_s28, %s342_s1 }
  0x16   :  { %p220_p10 = pnand %p218_p9, %p215_p8 }
  0x18   :  { %223 = shalt.err (!%p220_p10)
}
  0x19   :  { %s224_s6 = scalar_lea.vmem %s292_s15, 512  ;;  %p229_p12 = scmp.lt.s32.totalorder %s292_s15, %s292_s15 }
  0x1a   :  { %p225_p11 = scmp.ne.s32.totalorder %s292_s15, %s224_s6  ;;  %p230_p13 = scmp.lt.s32.totalorder %s224_s6, %s224_s6 }
  0x1c   :  { %p231_p0 = por %p230_p13, %p229_p12 }
  0x1e   :  { %p232_p1 = pnand %p231_p0, %p225_p11 }
  0x20   :  { %235 = shalt.err (!%p232_p1)
}
  0x21   :  { %s266_s0 = smov 128   ;;  %s267_s7 = smov 8  }
  0x22   :  { %32 = dma.hbm_to_vmem [thread:$0]  %s342_s1, 512, %s292_s15, [#allocation6], %s266_s0, %s266_s0, %s267_s7  }
  0x23   :  { %258 = dma.done.wait [#allocation3], 128  }
  0x24   :  { %259 = vsyncadd [#allocation3], 4294967168 }
  0x25   :  { %260 = dma.done.wait [#allocation6], 512  }
  0x26   :  { %261 = vsyncadd [#allocation6], 4294966784  ;;  %vm45_vm0 = vcmask 523264   ;;  %v268_v0 = vmov 0.0|0.0   ;;  %v269_v1 = vmov 0.0   ;;  %vm270_vm1 = vmmov 0  }
  0x27   :  { %178 = vmatprep.subr.bf16.mxu0 %v268_v0  ;;  %46 = vst.msk [vmem:[#allocation7] sm:$0xff] %vm45_vm0, %v269_v1  ;;  %175 = vmatprep.mubr.msk.f32.mxu0 %vm270_vm1, %v269_v1  ;;  %v49_v2 = vld [vmem:[#allocation5] sm:$0xff]  ;;  %v50_v3 = vld [vmem:[#allocation5 + $0x8] sm:$0xff]  ;;  %v51_v4 = vld [vmem:[#allocation5 + $0x10] sm:$0xff]  ;;  %vm53_vm2 = vcmask 261120   ;;  %s271_s11 = smov [#allocation7]  }
  0x28   :  { %v179_v5 = vpack.c.bf16 %v50_v3, %v49_v2  ;;  %v52_v6 = vld [vmem:[#allocation5 + $0x18] sm:$0xff]  ;;  %s150_s12 = sshll.u32 %s271_s11, 4  ;;  %s151_s12 = int_to_ptr.vmem [resolvable:$true] %s150_s12 }
  0x29   :  { %v182_v7 = vpack.c.bf16 %v52_v6, %v51_v4  ;;  %v48_v8 = vld [vmem:[#allocation2] sm:$0xff]  ;;  %s236_s13 = scalar_lea.vmem %s151_s12, 128  ;;  %p241_p3 = scmp.lt.s32.totalorder %s151_s12, %s151_s12 }
  0x2a   :  { %180 = vmatpush3.bf16.msra.mxu0 %v179_v5  ;;  %v161_v14 = vld [vmem:[%s343_s2] ss:$0 sm:$0xff]  ;;  %p237_p2 = scmp.ne.s32.totalorder %s151_s12, %s236_s13  ;;  %p242_p4 = scmp.lt.s32.totalorder %s236_s13, %s236_s13 }
  0x2b   :  { %181 = vmatprep.subr.bf16.mxu0 %v268_v0 }
  0x2c   :  { %p243_p5 = por %p242_p4, %p241_p3 }
  0x2e   :  { %183 = vmatpush3.bf16.msra.mxu0 %v182_v7  ;;  %v47_v9 = vld [vmem:[#allocation7] sm:$0xff]  ;;  %p244_p6 = pnand %p243_p5, %p237_p2 }
  0x31   :  { %176 = vmatmul.mubr.msk.f32.vlgmr.msra.gmra.mrb[0].mxu0 %vm53_vm2, %v48_v8 }
 0x104   :  { %v123_v10 = vpop.f32.mrb[0].mxu0 }
 0x105   :  { %v127_v11 = vadd.f32 %v123_v10, %v47_v9  ;;  %v177_v12 = vpop.f32.mrb[1].mxu0 }
 0x107   :  { %129 = vst.msk [vmem:[#allocation7] sm:$0xff] %vm45_vm0, %v127_v11 }
 0x10e   :  { %v133_v13 = vld [vmem:[#allocation7] sm:$0xff] }
 0x10f   :  { %v134_v15 = vmul.f32 0.25, %v133_v13 }
 0x111   :  { %v142_v16 = vadd.f32 %v161_v14, %v134_v15 }
 0x113   :  { %143 = vst.msk [vmem:[#allocation7] sm:$0xff] %vm45_vm0, %v142_v16 }
 0x114   :  { %247 = shalt.err (!%p244_p6)
}
 0x115   :  { %s248_s16 = scalar_lea.hbm %s344_s3, 128 }
 0x116   :  { %p249_p7 = scmp.ne.s32.totalorder %s344_s3, %s248_s16  ;;  %p252_p8 = scmp.lt.u32.totalorder %s248_s16, %s344_s3 }
 0x118   :  { %p254_p9 = pnand %p252_p8, %p249_p7 }
 0x11a   :  { %257 = shalt.err (!%p254_p9)
}
 0x11b   :  { %153 = dma.vmem_to_hbm [thread:$0]  %s151_s12, 128, %s344_s3, [#allocation4]  }
 0x11c   :  { %262 = dma.done.wait [#allocation4], 128  }
 0x11d   :  { %263 = vsyncadd [#allocation4], 4294967168 }
 0x11e   :  { %157 = vsyncpa [#allocation3], 1 }
 0x11f   :  { %158 = vsyncpa [#allocation6], 1 }
 0x120   :  { %159 = vsyncpa [#allocation4], 1 }

</bundles_post_ra>
